<compile_context>
chip_gen: v5e
topology: v5e:2x2
jax: 0.10.0
libtpu: 0.0.40
codegen_flags: <defaults>
</compile_context>

<pallas_src>
import functools

import jax
import jax.numpy as jnp
import numpy as np
from jax.experimental import pallas as pl
from jax.experimental.pallas import tpu as pltpu


# ----------------------------------------------------------------------------
# Fast path: embedding table VMEM-resident, one grid step per batch tile.
# ----------------------------------------------------------------------------
def _mlp_resident_kernel(ids_ref, table_ref, w_ref, b_ref, out_ref, x_ref, *,
                         b_tile, seq_len, embed_size):
    """One grid step = one tile of `b_tile` batch rows (all S tokens at once).

    ids_ref  : (B_pad*S,) int32  scalar-prefetched token ids (SMEM)
    table_ref: (V, E) f32        full embedding table, VMEM-resident
    w_ref    : (1, S*E) f32      full linear weight, VMEM-resident
    b_ref    : (1,) f32          linear bias (SMEM)
    out_ref  : (b_tile, 1) f32   sigmoid(logits) for this batch tile
    x_ref    : (b_tile, S*E) f32 gathered & flattened activations (scratch)
    """
    tile = pl.program_id(0)
    base = tile * (b_tile * seq_len)

    # In-VMEM gather (fully unrolled; b_tile*seq_len is small): each read pulls
    # one (1, E) row by dynamic sublane index and stores it at its static
    # flattened offset s*E, building the (batch, S*E) activation slab.
    for b in range(b_tile):
        for s in range(seq_len):
            tok = ids_ref[base + b * seq_len + s]
            x_ref[pl.ds(b, 1), pl.ds(s * embed_size, embed_size)] = (
                table_ref[pl.ds(tok, 1), :])

    # Fused flatten -> Linear(S*E -> 1) -> Sigmoid, exact f32 on the VPU.
    prod = x_ref[...] * w_ref[...]                               # (b_tile, S*E)
    logits = jnp.sum(prod, axis=1, keepdims=True) + b_ref[0]     # (b_tile, 1)
    out_ref[...] = jax.nn.sigmoid(logits)


def _forward_resident_table(ids, table, w_flat, bias, *, b_tile,
                            vmem_limit_bytes=None):
    B, S = ids.shape
    V, E = table.shape
    num_tiles = pl.cdiv(B, b_tile)
    b_pad = num_tiles * b_tile
    if b_pad != B:
        # Pad with token 0 (valid after clamping); padded rows are sliced off.
        ids = jnp.pad(ids, ((0, b_pad - B), (0, 0)))
    ids_flat = ids.reshape(b_pad * S)    # 1-D SMEM: pads only to next pow2 bytes

    grid_spec = pltpu.PrefetchScalarGridSpec(
        num_scalar_prefetch=1,           # ids -> SMEM
        grid=(num_tiles,),
        in_specs=[
            # Full table, constant index map -> one bulk DMA, stays resident.
            pl.BlockSpec((V, E), lambda i, ids_s: (0, 0)),
            # Full weight, constant index map -> one DMA, stays resident.
            pl.BlockSpec((1, S * E), lambda i, ids_s: (0, 0)),
            # Bias scalar in SMEM (no padded VMEM tile / extra DMA).
            pl.BlockSpec(memory_space=pltpu.MemorySpace.SMEM),
        ],
        out_specs=pl.BlockSpec((b_tile, 1), lambda i, ids_s: (i, 0)),
        scratch_shapes=[pltpu.VMEM((b_tile, S * E), jnp.float32)],
    )

    out = pl.pallas_call(
        functools.partial(_mlp_resident_kernel, b_tile=b_tile, seq_len=S,
                          embed_size=E),
        out_shape=jax.ShapeDtypeStruct((b_pad, 1), jnp.float32),
        grid_spec=grid_spec,
        compiler_params=pltpu.CompilerParams(
            # Batch tiles are independent: shards across the 2 TensorCores on
            # v7x once num_tiles >= 2 (B >= 16); harmless on v5e/v6e.
            dimension_semantics=("parallel",),
            vmem_limit_bytes=vmem_limit_bytes),
    )(ids_flat, table, w_flat, bias)
    return out[:B]


# ----------------------------------------------------------------------------
# Fallback path: table too large for VMEM -> per-token data-dependent gather.
# ----------------------------------------------------------------------------
def _mlp_gather_kernel(ids_ref, emb_ref, w_ref, b_ref, out_ref, acc_ref):
    """One grid step = one token (b, s).

    NOTE: correctness relies on the s axis being the innermost *sequential*
    ('arbitrary') axis with the output block index constant in s (accumulator
    pattern); do not reorder the grid or mark s 'parallel'.
    """
    s = pl.program_id(1)

    @pl.when(s == 0)
    def _init():
        acc_ref[...] = jnp.zeros_like(acc_ref)

    # Contribution of token s: gathered embedding row * resident weight row s.
    acc_ref[...] += emb_ref[0] * w_ref[pl.ds(s, 1), :]           # (1, E)

    @pl.when(s == pl.num_programs(1) - 1)
    def _finalize():
        logit = jnp.sum(acc_ref[...], axis=1, keepdims=True) + b_ref[0]
        out_ref[0] = jax.nn.sigmoid(logit)


def _forward_row_gather(ids, table, w_flat, bias):
    B, S = ids.shape
    V, E = table.shape
    ids_flat = ids.reshape(B * S)            # 1-D SMEM (cheap padding)
    table3 = table.reshape(V, 1, E)          # HBM-resident, row-gathered
    w2 = w_flat.reshape(S, E)                # flatten order s*E + e

    grid_spec = pltpu.PrefetchScalarGridSpec(
        num_scalar_prefetch=1,
        grid=(B, S),
        in_specs=[
            # Data-dependent gather: block index along dim0 is the token id.
            # Triple-buffered: the loop is otherwise pure DMA latency.
            pl.BlockSpec((1, 1, E),
                         lambda b, s, ids_s: (ids_s[b * S + s], 0, 0),
                         pipeline_mode=pl.Buffered(3)),
            # Full weight, constant index -> DMA'd once, stays resident.
            pl.BlockSpec((S, E), lambda b, s, ids_s: (0, 0)),
            pl.BlockSpec(memory_space=pltpu.MemorySpace.SMEM),
        ],
        out_specs=pl.BlockSpec((1, 1, 1), lambda b, s, ids_s: (b, 0, 0)),
        scratch_shapes=[pltpu.VMEM((1, E), jnp.float32)],
    )

    out = pl.pallas_call(
        _mlp_gather_kernel,
        out_shape=jax.ShapeDtypeStruct((B, 1, 1), jnp.float32),
        grid_spec=grid_spec,
        compiler_params=pltpu.CompilerParams(
            dimension_semantics=("parallel", "arbitrary")),
    )(ids_flat, table3, w2, bias)
    return out.reshape(B, 1)


# ----------------------------------------------------------------------------
# Dispatcher + reference
# ----------------------------------------------------------------------------
def _resident_vmem_budget_bytes():
    cap = 64 * 1024 * 1024                   # conservative default (v7x-like)
    try:
        info = pltpu.get_tpu_info()
        cap = int(getattr(info, "vmem_capacity_bytes", cap)) or cap
    except Exception:
        pass
    # Keep resident operands well under scoped VMEM and leave headroom for
    # buffers/scratch: v5e/v6e (128 MiB) -> 32 MiB budget, v7x (64 MiB) -> 16 MiB.
    return cap // 4


def mlp_net_forward(ids, embed_table, lin_w, lin_b):
    """ids: (B, S) int; embed_table: (V, E); lin_w: (1, S*E); lin_b: (1,)."""
    B, S = ids.shape
    V, E = embed_table.shape

    ids_i32 = jnp.clip(ids.astype(jnp.int32), 0, V - 1)   # guard the gather
    table = embed_table.astype(jnp.float32)
    w_flat = lin_w.astype(jnp.float32).reshape(1, S * E)   # flatten order s*E + e
    bias = lin_b.astype(jnp.float32).reshape(1)

    b_tile = B if B <= 8 else 8
    resident_bytes = 4 * (V * E + S * E + b_tile * S * E)
    budget = _resident_vmem_budget_bytes()

    if resident_bytes <= budget:
        vmem_limit = None
        if resident_bytes > (12 << 20):      # above default scoped VMEM: raise it
            vmem_limit = resident_bytes + (8 << 20)
        return _forward_resident_table(ids_i32, table, w_flat, bias,
                                       b_tile=b_tile,
                                       vmem_limit_bytes=vmem_limit)

    # TODO(synk): for very large vocabularies on v6e/v7x, store the table (and
    # weight) in bf16 in HBM and upcast after the gather to halve DMA bytes
    # (keep f32 end-to-end on v5e, whose VPU has no bf16).
    return _forward_row_gather(ids_i32, table, w_flat, bias)


def mlp_net_reference(ids, embed_table, lin_w, lin_b):
    """Pure-JAX reference mirroring the PyTorch forward (exact f32 math)."""
    B, S = ids.shape
    E = embed_table.shape[1]
    x = embed_table[ids].reshape(B, S * E)                        # (B, S*E)
    logits = jnp.sum(x * lin_w.reshape(1, S * E), axis=1,
                     keepdims=True) + lin_b                       # (B, 1)
    return jax.nn.sigmoid(logits).astype(jnp.float32)


if __name__ == "__main__":
    batch_size, seq_len, voc_size = 2, 8, 32
    embed_size = 16

    key = jax.random.PRNGKey(0)
    k_ids, k_emb, k_w, k_b = jax.random.split(key, 4)

    ids = jax.random.randint(k_ids, (batch_size, seq_len), 0, voc_size,
                             dtype=jnp.int32)
    # Deterministic synthetic parameters (shapes match nn.Embedding / nn.Linear).
    embed_table = jax.random.normal(k_emb, (voc_size, embed_size),
                                    dtype=jnp.float32)
    bound = 1.0 / np.sqrt(embed_size * seq_len)
    lin_w = jax.random.uniform(k_w, (1, embed_size * seq_len),
                               minval=-bound, maxval=bound, dtype=jnp.float32)
    lin_b = jax.random.uniform(k_b, (1,), minval=-bound, maxval=bound,
                               dtype=jnp.float32)

    out = jax.block_until_ready(mlp_net_forward(ids, embed_table, lin_w, lin_b))
    ref = jax.block_until_ready(mlp_net_reference(ids, embed_table, lin_w, lin_b))
    np.testing.assert_allclose(np.asarray(out), np.asarray(ref),
                               rtol=1e-5, atol=1e-5)

    print("KERNEL_OK")
</pallas_src>

<mosaic_0001>
module attributes {stable_mosaic.version = 11 : i64} {
  func.func @_mlp_resident_kernel(%arg0: i32, %arg1: memref<16xi32, #tpu.memory_space<smem>>, %arg2: memref<32x16xf32, #tpu.memory_space<vmem>>, %arg3: memref<1x128xf32, #tpu.memory_space<vmem>>, %arg4: memref<1xf32, #tpu.memory_space<smem>>, %arg5: memref<2x1xf32, #tpu.memory_space<vmem>>, %arg6: memref<2x128xf32, #tpu.memory_space<vmem>>) attributes {dimension_semantics = [#tpu.dimension_semantics<parallel>], iteration_bounds = array<i64: 1>, scalar_prefetch = 1 : i64, scratch_operands = 1 : i64, tpu.core_type = #tpu.core_type<tc>, window_params = [{pipeline_mode = #tpu.pipeline_mode<synchronous>, transform_indices = @transform_0, window_bounds = array<i64: 32, 16>}, {pipeline_mode = #tpu.pipeline_mode<synchronous>, transform_indices = @transform_1, window_bounds = array<i64: 1, 128>}, {transform_indices = @transform_2, window_bounds = array<i64: 1>}, {transform_indices = @transform_3, window_bounds = array<i64: 2, 1>}]} {
    %c16_i32 = arith.constant 16 : i32
    %0 = arith.muli %arg0, %c16_i32 : i32
    %c0_i32 = arith.constant 0 : i32
    %1 = arith.addi %0, %c0_i32 : i32
    %c0_i32_0 = arith.constant 0 : i32
    %2 = arith.addi %1, %c0_i32_0 : i32
    %3 = arith.index_cast %2 : i32 to index
    %4 = memref.load %arg1[%3] : memref<16xi32, #tpu.memory_space<smem>>
    %5 = arith.index_cast %4 : i32 to index
    %c0 = arith.constant 0 : index
    %6 = vector.load %arg2[%5, %c0] : memref<32x16xf32, #tpu.memory_space<vmem>>, vector<1x16xf32>
    %c0_1 = arith.constant 0 : index
    %c0_2 = arith.constant 0 : index
    %7 = vector.load %arg6[%c0_1, %c0_2] : memref<2x128xf32, #tpu.memory_space<vmem>>, vector<1x16xf32>
    tpu.vector_store %arg6[%c0_1, %c0_2], %6 {strides = array<i32>} : memref<2x128xf32, #tpu.memory_space<vmem>>, vector<1x16xf32>,
    %c0_i32_3 = arith.constant 0 : i32
    %8 = arith.addi %0, %c0_i32_3 : i32
    %c1_i32 = arith.constant 1 : i32
    %9 = arith.addi %8, %c1_i32 : i32
    %10 = arith.index_cast %9 : i32 to index
    %11 = memref.load %arg1[%10] : memref<16xi32, #tpu.memory_space<smem>>
    %12 = arith.index_cast %11 : i32 to index
    %c0_4 = arith.constant 0 : index
    %13 = vector.load %arg2[%12, %c0_4] : memref<32x16xf32, #tpu.memory_space<vmem>>, vector<1x16xf32>
    %c0_5 = arith.constant 0 : index
    %c16 = arith.constant 16 : index
    %14 = vector.load %arg6[%c0_5, %c16] : memref<2x128xf32, #tpu.memory_space<vmem>>, vector<1x16xf32>
    tpu.vector_store %arg6[%c0_5, %c16], %13 {strides = array<i32>} : memref<2x128xf32, #tpu.memory_space<vmem>>, vector<1x16xf32>,
    %c0_i32_6 = arith.constant 0 : i32
    %15 = arith.addi %0, %c0_i32_6 : i32
    %c2_i32 = arith.constant 2 : i32
    %16 = arith.addi %15, %c2_i32 : i32
    %17 = arith.index_cast %16 : i32 to index
    %18 = memref.load %arg1[%17] : memref<16xi32, #tpu.memory_space<smem>>
    %19 = arith.index_cast %18 : i32 to index
    %c0_7 = arith.constant 0 : index
    %20 = vector.load %arg2[%19, %c0_7] : memref<32x16xf32, #tpu.memory_space<vmem>>, vector<1x16xf32>
    %c0_8 = arith.constant 0 : index
    %c32 = arith.constant 32 : index
    %21 = vector.load %arg6[%c0_8, %c32] : memref<2x128xf32, #tpu.memory_space<vmem>>, vector<1x16xf32>
    tpu.vector_store %arg6[%c0_8, %c32], %20 {strides = array<i32>} : memref<2x128xf32, #tpu.memory_space<vmem>>, vector<1x16xf32>,
    %c0_i32_9 = arith.constant 0 : i32
    %22 = arith.addi %0, %c0_i32_9 : i32
    %c3_i32 = arith.constant 3 : i32
    %23 = arith.addi %22, %c3_i32 : i32
    %24 = arith.index_cast %23 : i32 to index
    %25 = memref.load %arg1[%24] : memref<16xi32, #tpu.memory_space<smem>>
    %26 = arith.index_cast %25 : i32 to index
    %c0_10 = arith.constant 0 : index
    %27 = vector.load %arg2[%26, %c0_10] : memref<32x16xf32, #tpu.memory_space<vmem>>, vector<1x16xf32>
    %c0_11 = arith.constant 0 : index
    %c48 = arith.constant 48 : index
    %28 = vector.load %arg6[%c0_11, %c48] : memref<2x128xf32, #tpu.memory_space<vmem>>, vector<1x16xf32>
    tpu.vector_store %arg6[%c0_11, %c48], %27 {strides = array<i32>} : memref<2x128xf32, #tpu.memory_space<vmem>>, vector<1x16xf32>,
    %c0_i32_12 = arith.constant 0 : i32
    %29 = arith.addi %0, %c0_i32_12 : i32
    %c4_i32 = arith.constant 4 : i32
    %30 = arith.addi %29, %c4_i32 : i32
    %31 = arith.index_cast %30 : i32 to index
    %32 = memref.load %arg1[%31] : memref<16xi32, #tpu.memory_space<smem>>
    %33 = arith.index_cast %32 : i32 to index
    %c0_13 = arith.constant 0 : index
    %34 = vector.load %arg2[%33, %c0_13] : memref<32x16xf32, #tpu.memory_space<vmem>>, vector<1x16xf32>
    %c0_14 = arith.constant 0 : index
    %c64 = arith.constant 64 : index
    %35 = vector.load %arg6[%c0_14, %c64] : memref<2x128xf32, #tpu.memory_space<vmem>>, vector<1x16xf32>
    tpu.vector_store %arg6[%c0_14, %c64], %34 {strides = array<i32>} : memref<2x128xf32, #tpu.memory_space<vmem>>, vector<1x16xf32>,
    %c0_i32_15 = arith.constant 0 : i32
    %36 = arith.addi %0, %c0_i32_15 : i32
    %c5_i32 = arith.constant 5 : i32
    %37 = arith.addi %36, %c5_i32 : i32
    %38 = arith.index_cast %37 : i32 to index
    %39 = memref.load %arg1[%38] : memref<16xi32, #tpu.memory_space<smem>>
    %40 = arith.index_cast %39 : i32 to index
    %c0_16 = arith.constant 0 : index
    %41 = vector.load %arg2[%40, %c0_16] : memref<32x16xf32, #tpu.memory_space<vmem>>, vector<1x16xf32>
    %c0_17 = arith.constant 0 : index
    %c80 = arith.constant 80 : index
    %42 = vector.load %arg6[%c0_17, %c80] : memref<2x128xf32, #tpu.memory_space<vmem>>, vector<1x16xf32>
    tpu.vector_store %arg6[%c0_17, %c80], %41 {strides = array<i32>} : memref<2x128xf32, #tpu.memory_space<vmem>>, vector<1x16xf32>,
    %c0_i32_18 = arith.constant 0 : i32
    %43 = arith.addi %0, %c0_i32_18 : i32
    %c6_i32 = arith.constant 6 : i32
    %44 = arith.addi %43, %c6_i32 : i32
    %45 = arith.index_cast %44 : i32 to index
    %46 = memref.load %arg1[%45] : memref<16xi32, #tpu.memory_space<smem>>
    %47 = arith.index_cast %46 : i32 to index
    %c0_19 = arith.constant 0 : index
    %48 = vector.load %arg2[%47, %c0_19] : memref<32x16xf32, #tpu.memory_space<vmem>>, vector<1x16xf32>
    %c0_20 = arith.constant 0 : index
    %c96 = arith.constant 96 : index
    %49 = vector.load %arg6[%c0_20, %c96] : memref<2x128xf32, #tpu.memory_space<vmem>>, vector<1x16xf32>
    tpu.vector_store %arg6[%c0_20, %c96], %48 {strides = array<i32>} : memref<2x128xf32, #tpu.memory_space<vmem>>, vector<1x16xf32>,
    %c0_i32_21 = arith.constant 0 : i32
    %50 = arith.addi %0, %c0_i32_21 : i32
    %c7_i32 = arith.constant 7 : i32
    %51 = arith.addi %50, %c7_i32 : i32
    %52 = arith.index_cast %51 : i32 to index
    %53 = memref.load %arg1[%52] : memref<16xi32, #tpu.memory_space<smem>>
    %54 = arith.index_cast %53 : i32 to index
    %c0_22 = arith.constant 0 : index
    %55 = vector.load %arg2[%54, %c0_22] : memref<32x16xf32, #tpu.memory_space<vmem>>, vector<1x16xf32>
    %c0_23 = arith.constant 0 : index
    %c112 = arith.constant 112 : index
    %56 = vector.load %arg6[%c0_23, %c112] : memref<2x128xf32, #tpu.memory_space<vmem>>, vector<1x16xf32>
    tpu.vector_store %arg6[%c0_23, %c112], %55 {strides = array<i32>} : memref<2x128xf32, #tpu.memory_space<vmem>>, vector<1x16xf32>,
    %c8_i32 = arith.constant 8 : i32
    %57 = arith.addi %0, %c8_i32 : i32
    %c0_i32_24 = arith.constant 0 : i32
    %58 = arith.addi %57, %c0_i32_24 : i32
    %59 = arith.index_cast %58 : i32 to index
    %60 = memref.load %arg1[%59] : memref<16xi32, #tpu.memory_space<smem>>
    %61 = arith.index_cast %60 : i32 to index
    %c0_25 = arith.constant 0 : index
    %62 = vector.load %arg2[%61, %c0_25] : memref<32x16xf32, #tpu.memory_space<vmem>>, vector<1x16xf32>
    %c1 = arith.constant 1 : index
    %c0_26 = arith.constant 0 : index
    %63 = vector.load %arg6[%c1, %c0_26] : memref<2x128xf32, #tpu.memory_space<vmem>>, vector<1x16xf32>
    tpu.vector_store %arg6[%c1, %c0_26], %62 {strides = array<i32>} : memref<2x128xf32, #tpu.memory_space<vmem>>, vector<1x16xf32>,
    %c8_i32_27 = arith.constant 8 : i32
    %64 = arith.addi %0, %c8_i32_27 : i32
    %c1_i32_28 = arith.constant 1 : i32
    %65 = arith.addi %64, %c1_i32_28 : i32
    %66 = arith.index_cast %65 : i32 to index
    %67 = memref.load %arg1[%66] : memref<16xi32, #tpu.memory_space<smem>>
    %68 = arith.index_cast %67 : i32 to index
    %c0_29 = arith.constant 0 : index
    %69 = vector.load %arg2[%68, %c0_29] : memref<32x16xf32, #tpu.memory_space<vmem>>, vector<1x16xf32>
    %c1_30 = arith.constant 1 : index
    %c16_31 = arith.constant 16 : index
    %70 = vector.load %arg6[%c1_30, %c16_31] : memref<2x128xf32, #tpu.memory_space<vmem>>, vector<1x16xf32>
    tpu.vector_store %arg6[%c1_30, %c16_31], %69 {strides = array<i32>} : memref<2x128xf32, #tpu.memory_space<vmem>>, vector<1x16xf32>,
    %c8_i32_32 = arith.constant 8 : i32
    %71 = arith.addi %0, %c8_i32_32 : i32
    %c2_i32_33 = arith.constant 2 : i32
    %72 = arith.addi %71, %c2_i32_33 : i32
    %73 = arith.index_cast %72 : i32 to index
    %74 = memref.load %arg1[%73] : memref<16xi32, #tpu.memory_space<smem>>
    %75 = arith.index_cast %74 : i32 to index
    %c0_34 = arith.constant 0 : index
    %76 = vector.load %arg2[%75, %c0_34] : memref<32x16xf32, #tpu.memory_space<vmem>>, vector<1x16xf32>
    %c1_35 = arith.constant 1 : index
    %c32_36 = arith.constant 32 : index
    %77 = vector.load %arg6[%c1_35, %c32_36] : memref<2x128xf32, #tpu.memory_space<vmem>>, vector<1x16xf32>
    tpu.vector_store %arg6[%c1_35, %c32_36], %76 {strides = array<i32>} : memref<2x128xf32, #tpu.memory_space<vmem>>, vector<1x16xf32>,
    %c8_i32_37 = arith.constant 8 : i32
    %78 = arith.addi %0, %c8_i32_37 : i32
    %c3_i32_38 = arith.constant 3 : i32
    %79 = arith.addi %78, %c3_i32_38 : i32
    %80 = arith.index_cast %79 : i32 to index
    %81 = memref.load %arg1[%80] : memref<16xi32, #tpu.memory_space<smem>>
    %82 = arith.index_cast %81 : i32 to index
    %c0_39 = arith.constant 0 : index
    %83 = vector.load %arg2[%82, %c0_39] : memref<32x16xf32, #tpu.memory_space<vmem>>, vector<1x16xf32>
    %c1_40 = arith.constant 1 : index
    %c48_41 = arith.constant 48 : index
    %84 = vector.load %arg6[%c1_40, %c48_41] : memref<2x128xf32, #tpu.memory_space<vmem>>, vector<1x16xf32>
    tpu.vector_store %arg6[%c1_40, %c48_41], %83 {strides = array<i32>} : memref<2x128xf32, #tpu.memory_space<vmem>>, vector<1x16xf32>,
    %c8_i32_42 = arith.constant 8 : i32
    %85 = arith.addi %0, %c8_i32_42 : i32
    %c4_i32_43 = arith.constant 4 : i32
    %86 = arith.addi %85, %c4_i32_43 : i32
    %87 = arith.index_cast %86 : i32 to index
    %88 = memref.load %arg1[%87] : memref<16xi32, #tpu.memory_space<smem>>
    %89 = arith.index_cast %88 : i32 to index
    %c0_44 = arith.constant 0 : index
    %90 = vector.load %arg2[%89, %c0_44] : memref<32x16xf32, #tpu.memory_space<vmem>>, vector<1x16xf32>
    %c1_45 = arith.constant 1 : index
    %c64_46 = arith.constant 64 : index
    %91 = vector.load %arg6[%c1_45, %c64_46] : memref<2x128xf32, #tpu.memory_space<vmem>>, vector<1x16xf32>
    tpu.vector_store %arg6[%c1_45, %c64_46], %90 {strides = array<i32>} : memref<2x128xf32, #tpu.memory_space<vmem>>, vector<1x16xf32>,
    %c8_i32_47 = arith.constant 8 : i32
    %92 = arith.addi %0, %c8_i32_47 : i32
    %c5_i32_48 = arith.constant 5 : i32
    %93 = arith.addi %92, %c5_i32_48 : i32
    %94 = arith.index_cast %93 : i32 to index
    %95 = memref.load %arg1[%94] : memref<16xi32, #tpu.memory_space<smem>>
    %96 = arith.index_cast %95 : i32 to index
    %c0_49 = arith.constant 0 : index
    %97 = vector.load %arg2[%96, %c0_49] : memref<32x16xf32, #tpu.memory_space<vmem>>, vector<1x16xf32>
    %c1_50 = arith.constant 1 : index
    %c80_51 = arith.constant 80 : index
    %98 = vector.load %arg6[%c1_50, %c80_51] : memref<2x128xf32, #tpu.memory_space<vmem>>, vector<1x16xf32>
    tpu.vector_store %arg6[%c1_50, %c80_51], %97 {strides = array<i32>} : memref<2x128xf32, #tpu.memory_space<vmem>>, vector<1x16xf32>,
    %c8_i32_52 = arith.constant 8 : i32
    %99 = arith.addi %0, %c8_i32_52 : i32
    %c6_i32_53 = arith.constant 6 : i32
    %100 = arith.addi %99, %c6_i32_53 : i32
    %101 = arith.index_cast %100 : i32 to index
    %102 = memref.load %arg1[%101] : memref<16xi32, #tpu.memory_space<smem>>
    %103 = arith.index_cast %102 : i32 to index
    %c0_54 = arith.constant 0 : index
    %104 = vector.load %arg2[%103, %c0_54] : memref<32x16xf32, #tpu.memory_space<vmem>>, vector<1x16xf32>
    %c1_55 = arith.constant 1 : index
    %c96_56 = arith.constant 96 : index
    %105 = vector.load %arg6[%c1_55, %c96_56] : memref<2x128xf32, #tpu.memory_space<vmem>>, vector<1x16xf32>
    tpu.vector_store %arg6[%c1_55, %c96_56], %104 {strides = array<i32>} : memref<2x128xf32, #tpu.memory_space<vmem>>, vector<1x16xf32>,
    %c8_i32_57 = arith.constant 8 : i32
    %106 = arith.addi %0, %c8_i32_57 : i32
    %c7_i32_58 = arith.constant 7 : i32
    %107 = arith.addi %106, %c7_i32_58 : i32
    %108 = arith.index_cast %107 : i32 to index
    %109 = memref.load %arg1[%108] : memref<16xi32, #tpu.memory_space<smem>>
    %110 = arith.index_cast %109 : i32 to index
    %c0_59 = arith.constant 0 : index
    %111 = vector.load %arg2[%110, %c0_59] : memref<32x16xf32, #tpu.memory_space<vmem>>, vector<1x16xf32>
    %c1_60 = arith.constant 1 : index
    %c112_61 = arith.constant 112 : index
    %112 = vector.load %arg6[%c1_60, %c112_61] : memref<2x128xf32, #tpu.memory_space<vmem>>, vector<1x16xf32>
    tpu.vector_store %arg6[%c1_60, %c112_61], %111 {strides = array<i32>} : memref<2x128xf32, #tpu.memory_space<vmem>>, vector<1x16xf32>,
    %c0_62 = arith.constant 0 : index
    %c0_63 = arith.constant 0 : index
    %113 = vector.load %arg6[%c0_62, %c0_63] : memref<2x128xf32, #tpu.memory_space<vmem>>, vector<2x128xf32>
    %c0_64 = arith.constant 0 : index
    %c0_65 = arith.constant 0 : index
    %114 = vector.load %arg3[%c0_64, %c0_65] : memref<1x128xf32, #tpu.memory_space<vmem>>, vector<1x128xf32>
    %115 = vector.broadcast %114 : vector<1x128xf32> to vector<2x128xf32>
    %116 = arith.mulf %113, %115 : vector<2x128xf32>
    %cst = arith.constant dense<0.000000e+00> : vector<2xf32>
    %117 = vector.multi_reduction <add>, %116, %cst [1] : vector<2x128xf32> to vector<2xf32>
    %118 = vector.shape_cast %117 : vector<2xf32> to vector<2x1xf32>
    %c0_66 = arith.constant 0 : index
    %119 = memref.load %arg4[%c0_66] : memref<1xf32, #tpu.memory_space<smem>>
    %120 = vector.broadcast %119 : f32 to vector<2x1xf32>
    %121 = arith.addf %118, %120 : vector<2x1xf32>
    %122 = arith.negf %121 : vector<2x1xf32>
    %123 = math.exp %122 : vector<2x1xf32>
    %cst_67 = arith.constant 1.000000e+00 : f32
    %124 = vector.broadcast %cst_67 : f32 to vector<2x1xf32>
    %125 = arith.addf %124, %123 : vector<2x1xf32>
    %126 = arith.divf %124, %125 : vector<2x1xf32>
    %c0_68 = arith.constant 0 : index
    %c0_69 = arith.constant 0 : index
    %127 = vector.load %arg5[%c0_68, %c0_69] : memref<2x1xf32, #tpu.memory_space<vmem>>, vector<2x1xf32>
    tpu.vector_store %arg5[%c0_68, %c0_69], %126 {strides = array<i32>} : memref<2x1xf32, #tpu.memory_space<vmem>>, vector<2x1xf32>,
    return
  }
  func.func @transform_0(%arg0: i32, %arg1: memref<16xi32, #tpu.memory_space<smem>>) -> (i32, i32) {
    %c0_i32 = arith.constant 0 : i32
    %c0_i32_0 = arith.constant 0 : i32
    %c0_i32_1 = arith.constant 0 : i32
    return %c0_i32, %c0_i32_0 : i32, i32
  }
  func.func @transform_1(%arg0: i32, %arg1: memref<16xi32, #tpu.memory_space<smem>>) -> (i32, i32) {
    %c0_i32 = arith.constant 0 : i32
    %c0_i32_0 = arith.constant 0 : i32
    %c0_i32_1 = arith.constant 0 : i32
    return %c0_i32, %c0_i32_0 : i32, i32
  }
  func.func @transform_2(%arg0: i32, %arg1: memref<16xi32, #tpu.memory_space<smem>>) -> i32 {
    %c0_i32 = arith.constant 0 : i32
    %c0_i32_0 = arith.constant 0 : i32
    return %c0_i32 : i32
  }
  func.func @transform_3(%arg0: i32, %arg1: memref<16xi32, #tpu.memory_space<smem>>) -> (i32, i32) {
    %c0_i32 = arith.constant 0 : i32
    %c0_i32_0 = arith.constant 0 : i32
    return %arg0, %c0_i32 : i32, i32
  }
}

</mosaic_0001>

<bundles_post_ra>
// kernel: tpu_custom_call.1
= control target key start
LH: loop header
LB: loop body
LE: loop exit
PB: predicated region body
PF: predicated region fallthrough
CT: control target
= control target key end

     0   :  { %s265_s18 = smov [#allocation4]   ;;  %s358_s0 = inlined_call_operand.vmem [shape: s32[16], index: 0, kind: input, shape index: {}]   ;;  %s359_s1 = inlined_call_operand.vmem [shape: f32[32,16], index: 1, kind: input, shape index: {}]   ;;  %s360_s2 = inlined_call_operand.vmem [shape: f32[1,128], index: 2, kind: input, shape index: {}]   ;;  %s361_s3 = inlined_call_operand.<no memory space> [shape: f32[1], index: 3, kind: input, shape index: {}]   ;;  %s362_s4 = inlined_call_operand.vmem [shape: f32[2,1], index: 4, kind: output, shape index: {}]  }
   0x1   :  { %s10_s17 = sshll.u32 %s358_s0, 4  ;;  %s11_s17 = int_to_ptr.vmem [resolvable:$true] %s10_s17 }
   0x2   :  { %13 = dma.vmem_to_smem %s11_s17, 16, %s265_s18, [#allocation3] }
   0x3   :  { %263 = dma.done.wait [#allocation3], 16 }
   0x4   :  { %264 = vsyncadd [#allocation3], 4294967280 }
   0x5   :  { %17 = sfence }
   0x6   :  { %s223_s19 = sld [smem:[#allocation4 + $0x2]]  ;;  %s266_s0 = smov 32   ;;  %vm28_vm0 = vcmask 122880   ;;  %vm38_vm1 = vcmask 254080   ;;  %vm48_vm2 = vcmask 385280   ;;  %vm58_vm3 = vcmask 516480  }
   0x7   :  { %s222_s20 = sld [smem:[#allocation4 + $0x1]]  ;;  %s267_s30 = smov 16   ;;  %vm68_vm4 = vcmask 647680   ;;  %vm78_vm5 = vcmask 778880   ;;  %vm88_vm6 = vcmask 910080   ;;  %vm98_vm7 = vcmask 1041280  }
   0x8   :  { %s231_s21 = sld [smem:[#allocation4 + $0xa]]  ;;  %s268_s17 = smov 48   ;;  %v246_v30 = vld [vmem:[%s360_s2] ss:$0 sm:$0xff]  ;;  %vm174_vm8 = vcmask 1041408   ;;  %v179_v34 = vstv %s361_s3  ;;  %vm200_vm11 = vcmask 1024  }
   0x9   :  { %s230_s22 = sld [smem:[#allocation4 + $0x9]]  ;;  %s272_s27 = smov 112  }
   0xa   :  { %s224_s29 = sld [smem:[#allocation4 + $0x3]] }
   0xb   :  { %s233_s5 = sld [smem:[#allocation4 + $0xc]] }
   0xc   :  { %s42_s25 = scalar_lea.vmem %s359_s1, %s223_s19  ;;  %s225_s12 = sld [smem:[#allocation4 + $0x4]] }
   0xd   :  { %v43_v0 = vld [vmem:[%s42_s25] sm:$0x1]  ;;  %s32_s28 = scalar_lea.vmem %s359_s1, %s222_s20  ;;  %s232_s13 = sld [smem:[#allocation4 + $0xb]] }
   0xe   :  { %45 = vrot.lane.b32.xlu1 %v43_v0, %s266_s0  ;;  %v33_v1 = vld [vmem:[%s32_s28] sm:$0x1]  ;;  %s116_s8 = scalar_lea.vmem %s359_s1, %s231_s21  ;;  %s227_s21 = sld [smem:[#allocation4 + $0x6]] }
   0xf   :  { %35 = vrot.lane.b32.xlu0 %v33_v1, %s267_s30  ;;  %s107_s11 = scalar_lea.vmem %s359_s1, %s230_s22  ;;  %v117_v2 = vld [vmem:[%s116_s8] sm:$0x1]  ;;  %s226_s25 = sld [smem:[#allocation4 + $0x5]] }
  0x10   :  { %v108_v3 = vld [vmem:[%s107_s11] sm:$0x1]  ;;  %s52_s16 = scalar_lea.vmem %s359_s1, %s224_s29  ;;  %s234_s29 = sld [smem:[#allocation4 + $0xd]] }
  0x11   :  { %v53_v4 = vld [vmem:[%s52_s16] sm:$0x1]  ;;  %s134_s20 = scalar_lea.vmem %s359_s1, %s233_s5  ;;  %s236_s7 = sld [smem:[#allocation4 + $0xf]] }
  0x12   :  { %55 = vrot.lane.b32.xlu2 %v53_v4, %s268_s17  ;;  %s62_s28 = scalar_lea.vmem %s359_s1, %s225_s12  ;;  %v135_v5 = vld [vmem:[%s134_s20] sm:$0x1]  ;;  %s235_s11 = sld [smem:[#allocation4 + $0xe]] }
  0x13   :  { %s125_s24 = scalar_lea.vmem %s359_s1, %s232_s13  ;;  %v63_v7 = vld [vmem:[%s62_s28] sm:$0x1]  ;;  %s228_s15 = sld [smem:[#allocation4 + $0x7]] }
  0x14   :  { %v126_v6 = vld [vmem:[%s125_s24] sm:$0x1]  ;;  %s82_s6 = scalar_lea.vmem %s359_s1, %s227_s21  ;;  %s270_s16 = smov 96  }
  0x15   :  { %s72_s10 = scalar_lea.vmem %s359_s1, %s226_s25  ;;  %v83_v8 = vld [vmem:[%s82_s6] sm:$0x1]  ;;  %s25_s28 = sld [smem:[#allocation4]] }
  0x16   :  { %119 = vrot.lane.b32.xlu1 %v117_v2, %s266_s0  ;;  %s269_s0 = smov 64   ;;  %s143_s14 = scalar_lea.vmem %s359_s1, %s234_s29  ;;  %v73_v9 = vld [vmem:[%s72_s10] sm:$0x1] }
  0x17   :  { %110 = vrot.lane.b32.xlu0 %v108_v3, %s267_s30  ;;  %v144_v10 = vld [vmem:[%s143_s14] sm:$0x1]  ;;  %s161_s20 = scalar_lea.vmem %s359_s1, %s236_s7  ;;  %s229_s5 = sld [smem:[#allocation4 + $0x8]] }
  0x18   :  { %s152_s22 = scalar_lea.vmem %s359_s1, %s235_s11  ;;  %v162_v11 = vld [vmem:[%s161_s20] sm:$0x1] }
  0x19   :  { %s92_s26 = scalar_lea.vmem %s359_s1, %s228_s15  ;;  %v153_v12 = vld [vmem:[%s152_s22] sm:$0x1] }
  0x1a   :  { %128 = vrot.lane.b32.xlu2 %v126_v6, %s268_s17  ;;  %s271_s17 = smov 80   ;;  %v93_v13 = vld [vmem:[%s92_s26] sm:$0x1] }
  0x1b   :  { %s26_s30 = scalar_lea.vmem %s359_s1, %s25_s28 }
  0x1c   :  { %v27_v14 = vld [vmem:[%s26_s30] sm:$0x1] }
  0x1d   :  { %29 = vst.msk [vmem:[#allocation2] sm:$0x1] %vm28_vm0, %v27_v14  ;;  %s102_s8 = scalar_lea.vmem %s359_s1, %s229_s5 }
  0x1e   :  { %137 = vrot.lane.b32.xlu1 %v135_v5, %s269_s0  ;;  %v103_v15 = vld [vmem:[%s102_s8] sm:$0x1] }
  0x1f   :  { %65 = vrot.lane.b32.xlu0 %v63_v7, %s269_s0  ;;  %104 = vst.msk [vmem:[#allocation2 + $0x1] sm:$0x1] %vm28_vm0, %v103_v15 }
  0x22   :  { %75 = vrot.lane.b32.xlu2 %v73_v9, %s271_s17 }
  0x26   :  { %85 = vrot.lane.b32.xlu1 %v83_v8, %s270_s16 }
  0x27   :  { %146 = vrot.lane.b32.xlu0 %v144_v10, %s271_s17 }
  0x2a   :  { %155 = vrot.lane.b32.xlu2 %v153_v12, %s270_s16 }
  0x2e   :  { %164 = vrot.lane.b32.xlu1 %v162_v11, %s272_s27 }
  0x2f   :  { %95 = vrot.lane.b32.xlu0 %v93_v13, %s272_s27 }
  0x6c   :  { %v56_v16 = vpop.permute.xlu2 %55 }
  0x74   :  { %v129_v19 = vpop.permute.xlu2 %128 }
  0x7c   :  { %v76_v22 = vpop.permute.xlu2 %75 }
  0x80   :  { %v46_v17 = vpop.permute.xlu1 %45 }
  0x81   :  { %v36_v18 = vpop.permute.xlu0 %35 }
  0x82   :  { %39 = vst.msk [vmem:[#allocation2] sm:$0x1] %vm38_vm1, %v36_v18 }
  0x83   :  { %49 = vst.msk [vmem:[#allocation2] sm:$0x1] %vm48_vm2, %v46_v17 }
  0x84   :  { %59 = vst.msk [vmem:[#allocation2] sm:$0x1] %vm58_vm3, %v56_v16  ;;  %v156_v26 = vpop.permute.xlu2 %155 }
  0x88   :  { %v120_v20 = vpop.permute.xlu1 %119 }
  0x89   :  { %v111_v21 = vpop.permute.xlu0 %110 }
  0x8a   :  { %113 = vst.msk [vmem:[#allocation2 + $0x1] sm:$0x1] %vm38_vm1, %v111_v21 }
  0x8b   :  { %122 = vst.msk [vmem:[#allocation2 + $0x1] sm:$0x1] %vm48_vm2, %v120_v20 }
  0x8c   :  { %131 = vst.msk [vmem:[#allocation2 + $0x1] sm:$0x1] %vm58_vm3, %v129_v19 }
  0x90   :  { %v138_v23 = vpop.permute.xlu1 %137 }
  0x91   :  { %140 = vst.msk [vmem:[#allocation2 + $0x1] sm:$0x1] %vm68_vm4, %v138_v23  ;;  %v66_v24 = vpop.permute.xlu0 %65 }
  0x92   :  { %69 = vst.msk [vmem:[#allocation2] sm:$0x1] %vm68_vm4, %v66_v24 }
  0x93   :  { %79 = vst.msk [vmem:[#allocation2] sm:$0x1] %vm78_vm5, %v76_v22 }
  0x98   :  { %v86_v25 = vpop.permute.xlu1 %85 }
  0x99   :  { %89 = vst.msk [vmem:[#allocation2] sm:$0x1] %vm88_vm6, %v86_v25  ;;  %v147_v27 = vpop.permute.xlu0 %146 }
  0x9a   :  { %149 = vst.msk [vmem:[#allocation2 + $0x1] sm:$0x1] %vm78_vm5, %v147_v27 }
  0x9b   :  { %158 = vst.msk [vmem:[#allocation2 + $0x1] sm:$0x1] %vm88_vm6, %v156_v26 }
  0xa0   :  { %v165_v28 = vpop.permute.xlu1 %164 }
  0xa1   :  { %167 = vst.msk [vmem:[#allocation2 + $0x1] sm:$0x1] %vm98_vm7, %v165_v28  ;;  %v96_v29 = vpop.permute.xlu0 %95 }
  0xa2   :  { %99 = vst.msk [vmem:[#allocation2] sm:$0x1] %vm98_vm7, %v96_v29 }
  0xa9   :  { %v168_v31 = vld [vmem:[#allocation2] sm:$0x3] }
  0xaa   :  { %v173_v32 = vmul.f32 %v246_v30, %v168_v31 }
  0xac   :  { %v175_v33 = vsel %vm174_vm8, %v173_v32, 0.0 }
  0xad   :  { %176 = vadd.xlane.f32.xlu2 %v175_v33 }
 0x120   :  { %v177_v35 = vpop.xlane.xlu2 %176 }
 0x121   :  { %v180_v36 = vadd.f32 %v179_v34, %v177_v35 }
 0x123   :  { %v237_v37 = vmul.f32 -1.442695, %v180_v36 }
 0x125   :  { %247 = vpow2.f32 %v237_v37 }
 0x12b   :  { %v248_v38 = vpop.eup %247 }
 0x12c   :  { %v184_v39 = vadd.f32 1.0, %v248_v38 }
 0x12e   :  { %249 = vrcp.f32 %v184_v39  ;;  %v196_v43 = vand.u32 2147483648, %v184_v39  ;;  %v194_v45 = vand.u32 2147483647, %v184_v39  ;;  %vm190_vm10 = vweird.f32 %v184_v39 }
 0x130   :  { %v197_v47 = vor.u32 1.1754944e-38, %v196_v43  ;;  %vm195_vm13 = vcmp.eq.f32.partialorder %v194_v45, 8.507059e+37 }
 0x134   :  { %v250_v40 = vpop.eup %249 }
 0x135   :  { %v186_v41 = vmul.f32 %v250_v40, %v184_v39  ;;  %vm191_vm9 = vweird.f32 %v250_v40 }
 0x136   :  { %vm192_vm12 = vmor %vm190_vm10, %vm191_vm9 }
 0x137   :  { %v187_v42 = vsub.f32 1.0, %v186_v41 }
 0x139   :  { %v188_v44 = vmul.f32 %v250_v40, %v187_v42 }
 0x13b   :  { %v189_v46 = vadd.f32 %v250_v40, %v188_v44 }
 0x13d   :  { %v193_v48 = vsel %vm192_vm12, %v250_v40, %v189_v46 }
 0x13e   :  { %v198_v49 = vsel %vm195_vm13, %v197_v47, %v193_v48 }
 0x13f   :  { %201 = vst.msk [vmem:[%s362_s4] sm:$0x3] %vm200_vm11, %v198_v49 }

</bundles_post_ra>
